<compile_context>
chip_gen: v6e
topology: v6e:2x2x1
jax: 0.10.0
libtpu: 0.0.40
codegen_flags: <defaults>
</compile_context>

<pallas_src>
import math
import functools

import jax
import jax.numpy as jnp
from jax.experimental import pallas as pl
from jax.experimental.pallas import tpu as pltpu

_H1 = 64
_H2 = 32
_LOG_2PI = math.log(2.0 * math.pi)


def _actor_critic_kernel(action_dim, bf16_activations,
                         state_ref, action_ref,
                         w1_ref, b1_ref, w2_ref, b2_ref, w3_ref, b3_ref,
                         iv_ref, out_ref):
    """One batch tile; the batch lives on the LANE axis.

    state_ref : (S, Bt)   matmul dtype      action_ref : (A, Bt)  f32
    w1_ref    : (2*H1, S)                   b1_ref     : (2*H1, 1) f32
    w2_ref    : (2*H2, 2*H1)  block-diag    b2_ref     : (2*H2, 1) f32
    w3_ref    : (A+1, 2*H2)   block-diag    b3_ref     : (A+1, 1) f32
    iv_ref    : (A+1, 1) f32   rows 0..A-1 = 1/var, row A = log_prob constant
    out_ref   : (A+2, Bt) f32  rows 0..A-1 = mean, row A = log_prob, row A+1 = value
    """
    mm_dtype = w1_ref.dtype
    act_dtype = jnp.bfloat16 if bf16_activations else jnp.float32

    def _layer(w_ref, b_ref, x):
        z = jnp.dot(w_ref[...], x, preferred_element_type=jnp.float32) + b_ref[...]
        return jnp.tanh(z.astype(act_dtype))

    h = _layer(w1_ref, b1_ref, state_ref[...])                            # (2*H1, Bt)
    h = _layer(w2_ref, b2_ref, h.astype(mm_dtype))                        # (2*H2, Bt)
    o = jnp.dot(w3_ref[...], h.astype(mm_dtype),
                preferred_element_type=jnp.float32) + b3_ref[...]         # (A+1, Bt) f32

    mean = jnp.tanh(o[:action_dim, :].astype(act_dtype)).astype(jnp.float32)  # (A, Bt)
    value = o[action_dim:action_dim + 1, :]                               # (1, Bt), no tanh

    # MultivariateNormal(mean, diag(var)).log_prob(action); constants in iv_ref.
    diff = action_ref[...] - mean                                         # (A, Bt) f32
    maha = jnp.sum(diff * diff * iv_ref[:action_dim, :],
                   axis=0, keepdims=True)                                 # (1, Bt)
    logp = -0.5 * maha + iv_ref[action_dim:action_dim + 1, :]             # (1, Bt)

    # Single merged output slab (lane-dense stores, one output DMA stream).
    out_ref[:action_dim, :] = mean
    out_ref[action_dim:action_dim + 1, :] = logp
    out_ref[action_dim + 1:action_dim + 2, :] = value


def _fuse_params(params, action_dim):
    """Build fused (out, in) weights for the actor|critic block structure."""
    (aw1, ab1, aw2, ab2, aw3, ab3, cw1, cb1, cw2, cb2, cw3, cb3) = params
    # layer 1: concat along output features
    w1 = jnp.concatenate([aw1, cw1], axis=1).T                     # (2*H1, S)
    b1 = jnp.concatenate([ab1, cb1]).reshape(-1, 1)                # (2*H1, 1)
    # layer 2: block diagonal
    z12 = jnp.zeros((_H1, _H2), jnp.float32)
    w2 = jnp.block([[aw2, z12], [z12, cw2]]).T                     # (2*H2, 2*H1)
    b2 = jnp.concatenate([ab2, cb2]).reshape(-1, 1)                # (2*H2, 1)
    # layer 3: block diagonal, outputs [mean (A) | value (1)]
    w3 = jnp.block([[aw3, jnp.zeros((_H2, 1), jnp.float32)],
                    [jnp.zeros((_H2, action_dim), jnp.float32), cw3]]).T   # (A+1, 2*H2)
    b3 = jnp.concatenate([ab3, cb3]).reshape(-1, 1)                # (A+1, 1)
    return w1, b1, w2, b2, w3, b3


def actor_critic_evaluate(state, action, params, action_var, *,
                          block_b=None,
                          matmul_dtype=jnp.bfloat16,
                          bf16_activations=False):
    """Pallas wrapper. state: (B, S), action: (B, A).

    Returns (action_mean (B,A), log_prob (B,), value (B,), entropy (B,)).
    """
    B, S = state.shape
    A = action.shape[-1]

    if block_b is None:
        # Large tile to amortize the ~0.35 us per-grid-step overhead and get
        # wide unmasked vst stores; but keep >= 2 grid steps when the batch
        # allows so both v7x TensorCores get work ("parallel" batch axis).
        block_b = min(8192, pl.cdiv(B, 128) * 128)
        if B >= 256 and pl.cdiv(B, block_b) < 2:
            block_b = max(128, pl.cdiv(pl.cdiv(B, 2), 128) * 128)
    assert block_b % 128 == 0
    n_tiles = pl.cdiv(B, block_b)

    params_f32 = tuple(jnp.asarray(p, jnp.float32) for p in params)
    w1, b1, w2, b2, w3, b3 = _fuse_params(params_f32, A)
    w1 = w1.astype(matmul_dtype)
    w2 = w2.astype(matmul_dtype)
    w3 = w3.astype(matmul_dtype)

    action_var = jnp.asarray(action_var, jnp.float32)
    inv_var = (1.0 / action_var).reshape(A, 1)
    logdet = jnp.sum(jnp.log(action_var))
    logp_const = (-0.5 * (A * _LOG_2PI + logdet)).reshape(1, 1).astype(jnp.float32)
    iv_const = jnp.concatenate([inv_var, logp_const], axis=0)      # (A+1, 1) resident
    entropy_const = 0.5 * A * (1.0 + _LOG_2PI) + 0.5 * logdet      # host-side constant

    # Batch on the lane axis.  No zero-pad materialization: the ragged last
    # block is handled by the pl.cdiv grid; padded lanes never feed a batch
    # reduction and are masked on output writeback.
    state_t = state.T.astype(matmul_dtype)                         # (S, B)
    action_t = action.T.astype(jnp.float32)                        # (A, B) f32 for log_prob accuracy

    def _resident(shape):
        return pl.BlockSpec(shape, lambda i: (0, 0))

    in_specs = [
        pl.BlockSpec((S, block_b), lambda i: (0, i)),              # state^T tile
        pl.BlockSpec((A, block_b), lambda i: (0, i)),              # action^T tile
        _resident(w1.shape), _resident(b1.shape),
        _resident(w2.shape), _resident(b2.shape),
        _resident(w3.shape), _resident(b3.shape),
        _resident(iv_const.shape),
    ]
    out_specs = pl.BlockSpec((A + 2, block_b), lambda i: (0, i))
    out_shape = jax.ShapeDtypeStruct((A + 2, B), jnp.float32)

    mm_bytes = jnp.dtype(matmul_dtype).itemsize
    flops = 2 * B * (2 * _H1 * S + (2 * _H2) * (2 * _H1) + (A + 1) * (2 * _H2))
    transcendentals = B * (2 * _H1 + 2 * _H2 + A)
    bytes_accessed = (B * (S * mm_bytes + A * 4 + (A + 2) * 4)
                      + (w1.size + w2.size + w3.size) * mm_bytes
                      + (b1.size + b2.size + b3.size + iv_const.size) * 4)

    out = pl.pallas_call(
        functools.partial(_actor_critic_kernel, A, bf16_activations),
        grid=(n_tiles,),
        in_specs=in_specs,
        out_specs=out_specs,
        out_shape=out_shape,
        compiler_params=pltpu.CompilerParams(
            dimension_semantics=("parallel",),
            # Headroom for block_b up to ~8192 (the (2*H1, block_b) f32
            # intermediate dominates); v5e's 16 MiB scoped default is the
            # binding one, 32 MiB is safe on every generation.
            vmem_limit_bytes=32 * 1024 * 1024,
        ),
        cost_estimate=pl.CostEstimate(flops=flops,
                                      transcendentals=transcendentals,
                                      bytes_accessed=bytes_accessed),
    )(state_t, action_t, w1, b1, w2, b2, w3, b3, iv_const)

    mean = out[:A, :].T                                             # (B, A)
    logp = out[A, :]                                                # (B,)
    value = out[A + 1, :]                                           # (B,)
    entropy = jnp.full((B,), entropy_const, jnp.float32)            # (B,) constant
    return mean, logp, value, entropy


def init_params(key, state_dim, action_dim):
    """PyTorch-style uniform(-1/sqrt(fan_in), 1/sqrt(fan_in)) init, weights as (in, out)."""
    dims_actor = [(state_dim, _H1), (_H1, _H2), (_H2, action_dim)]
    dims_critic = [(state_dim, _H1), (_H1, _H2), (_H2, 1)]
    params = []
    for (fan_in, fan_out) in dims_actor + dims_critic:
        key, kw, kb = jax.random.split(key, 3)
        bound = 1.0 / math.sqrt(fan_in)
        w = jax.random.uniform(kw, (fan_in, fan_out), jnp.float32, -bound, bound)
        b = jax.random.uniform(kb, (fan_out,), jnp.float32, -bound, bound)
        params += [w, b]
    return tuple(params)


def reference_evaluate(state, action, params, action_var):
    """Plain-JAX reference for sanity checking."""
    (aw1, ab1, aw2, ab2, aw3, ab3, cw1, cb1, cw2, cb2, cw3, cb3) = params
    h = jnp.tanh(state @ aw1 + ab1)
    h = jnp.tanh(h @ aw2 + ab2)
    mean = jnp.tanh(h @ aw3 + ab3)
    c = jnp.tanh(state @ cw1 + cb1)
    c = jnp.tanh(c @ cw2 + cb2)
    value = (c @ cw3 + cb3)[:, 0]
    k = mean.shape[-1]
    logdet = jnp.sum(jnp.log(action_var))
    diff = action - mean
    maha = jnp.sum(diff * diff / action_var, axis=-1)
    logp = -0.5 * (maha + k * math.log(2.0 * math.pi) + logdet)
    ent = jnp.full((mean.shape[0],),
                   0.5 * k * (1.0 + math.log(2.0 * math.pi)) + 0.5 * logdet)
    return mean, logp, value, ent


if __name__ == "__main__":
    # Small shapes consistent with the module; batch chosen to exercise a
    # multi-tile grid with a ragged last block (block_b=128 -> 2 grid steps).
    batch, state_dim, action_dim = 200, 8, 4
    action_std = 0.5

    key = jax.random.PRNGKey(0)
    k_state, k_action, k_params = jax.random.split(key, 3)

    state = jax.random.normal(k_state, (batch, state_dim), jnp.float32)
    action = jax.random.normal(k_action, (batch, action_dim), jnp.float32)
    params = init_params(k_params, state_dim, action_dim)
    action_var = jnp.full((action_dim,), action_std * action_std, jnp.float32)

    r_mean, r_logp, r_value, r_ent = reference_evaluate(state, action, params, action_var)

    # 1) Exact mode: f32 matmuls/activations, explicit small tile (2 grid steps,
    #    ragged last block). Tight tolerances.
    mean, logp, value, ent = actor_critic_evaluate(
        state, action, params, action_var,
        block_b=128, matmul_dtype=jnp.float32, bf16_activations=False)
    jax.block_until_ready((mean, logp, value, ent))
    assert jnp.allclose(mean, r_mean, atol=1e-5)
    assert jnp.allclose(logp, r_logp, atol=1e-4)
    assert jnp.allclose(value, r_value, atol=1e-5)
    assert jnp.allclose(ent, r_ent, atol=1e-5)

    # 2) Fast mode (default for v6e/v7x): bf16 matmul operands + bf16 tanh,
    #    f32 accumulation and f32 log-prob math, auto tile size.
    mean_b, logp_b, value_b, ent_b = actor_critic_evaluate(
        state, action, params, action_var, bf16_activations=True)
    jax.block_until_ready((mean_b, logp_b, value_b, ent_b))
    assert jnp.allclose(mean_b, r_mean, atol=5e-2, rtol=0.0)
    assert jnp.allclose(value_b, r_value, atol=5e-2, rtol=0.0)
    assert jnp.allclose(logp_b, r_logp, atol=1.0, rtol=0.0)
    assert jnp.allclose(ent_b, r_ent, atol=1e-5)

    print("KERNEL_OK")
</pallas_src>

<mosaic_0001>
module attributes {stable_mosaic.version = 11 : i64} {
  func.func @_actor_critic_kernel(%arg0: i32, %arg1: memref<8x128xf32, #tpu.memory_space<vmem>>, %arg2: memref<4x128xf32, #tpu.memory_space<vmem>>, %arg3: memref<128x8xf32, #tpu.memory_space<vmem>>, %arg4: memref<128x1xf32, #tpu.memory_space<vmem>>, %arg5: memref<64x128xf32, #tpu.memory_space<vmem>>, %arg6: memref<64x1xf32, #tpu.memory_space<vmem>>, %arg7: memref<5x64xf32, #tpu.memory_space<vmem>>, %arg8: memref<5x1xf32, #tpu.memory_space<vmem>>, %arg9: memref<5x1xf32, #tpu.memory_space<vmem>>, %arg10: memref<6x128xf32, #tpu.memory_space<vmem>>) attributes {dimension_semantics = [#tpu.dimension_semantics<parallel>], iteration_bounds = array<i64: 2>, scalar_prefetch = 0 : i64, scratch_operands = 0 : i64, tpu.core_type = #tpu.core_type<tc>, window_params = [{transform_indices = @transform_0, window_bounds = array<i64: 8, 128>}, {transform_indices = @transform_1, window_bounds = array<i64: 4, 128>}, {pipeline_mode = #tpu.pipeline_mode<synchronous>, transform_indices = @transform_2, window_bounds = array<i64: 128, 8>}, {pipeline_mode = #tpu.pipeline_mode<synchronous>, transform_indices = @transform_3, window_bounds = array<i64: 128, 1>}, {pipeline_mode = #tpu.pipeline_mode<synchronous>, transform_indices = @transform_4, window_bounds = array<i64: 64, 128>}, {pipeline_mode = #tpu.pipeline_mode<synchronous>, transform_indices = @transform_5, window_bounds = array<i64: 64, 1>}, {pipeline_mode = #tpu.pipeline_mode<synchronous>, transform_indices = @transform_6, window_bounds = array<i64: 5, 64>}, {pipeline_mode = #tpu.pipeline_mode<synchronous>, transform_indices = @transform_7, window_bounds = array<i64: 5, 1>}, {pipeline_mode = #tpu.pipeline_mode<synchronous>, transform_indices = @transform_8, window_bounds = array<i64: 5, 1>}, {transform_indices = @transform_9, window_bounds = array<i64: 6, 128>}]} {
    %c0 = arith.constant 0 : index
    %c0_0 = arith.constant 0 : index
    %0 = vector.load %arg1[%c0, %c0_0] : memref<8x128xf32, #tpu.memory_space<vmem>>, vector<8x128xf32>
    %c0_1 = arith.constant 0 : index
    %c0_2 = arith.constant 0 : index
    %1 = vector.load %arg3[%c0_1, %c0_2] : memref<128x8xf32, #tpu.memory_space<vmem>>, vector<128x8xf32>
    %cst = arith.constant dense<0.000000e+00> : vector<128x128xf32>
    %2 = tpu.matmul %1, %0, %cst {dimension_numbers = #tpu.dot_dimension_numbers<[1], [0], [0], [1], [0, 0, 1, 1], [], []>} : vector<128x8xf32>, vector<8x128xf32>, vector<128x128xf32> -> vector<128x128xf32>
    %c0_3 = arith.constant 0 : index
    %c0_4 = arith.constant 0 : index
    %3 = vector.load %arg4[%c0_3, %c0_4] : memref<128x1xf32, #tpu.memory_space<vmem>>, vector<128x1xf32>
    %4 = vector.broadcast %3 : vector<128x1xf32> to vector<128x128xf32>
    %5 = arith.addf %2, %4 : vector<128x128xf32>
    %6 = math.tanh %5 : vector<128x128xf32>
    %c0_5 = arith.constant 0 : index
    %c0_6 = arith.constant 0 : index
    %7 = vector.load %arg5[%c0_5, %c0_6] : memref<64x128xf32, #tpu.memory_space<vmem>>, vector<64x128xf32>
    %cst_7 = arith.constant dense<0.000000e+00> : vector<64x128xf32>
    %8 = tpu.matmul %7, %6, %cst_7 {dimension_numbers = #tpu.dot_dimension_numbers<[1], [0], [0], [1], [0, 0, 1, 1], [], []>} : vector<64x128xf32>, vector<128x128xf32>, vector<64x128xf32> -> vector<64x128xf32>
    %c0_8 = arith.constant 0 : index
    %c0_9 = arith.constant 0 : index
    %9 = vector.load %arg6[%c0_8, %c0_9] : memref<64x1xf32, #tpu.memory_space<vmem>>, vector<64x1xf32>
    %10 = vector.broadcast %9 : vector<64x1xf32> to vector<64x128xf32>
    %11 = arith.addf %8, %10 : vector<64x128xf32>
    %12 = math.tanh %11 : vector<64x128xf32>
    %c0_10 = arith.constant 0 : index
    %c0_11 = arith.constant 0 : index
    %13 = vector.load %arg7[%c0_10, %c0_11] : memref<5x64xf32, #tpu.memory_space<vmem>>, vector<5x64xf32>
    %cst_12 = arith.constant dense<0.000000e+00> : vector<5x128xf32>
    %14 = tpu.matmul %13, %12, %cst_12 {dimension_numbers = #tpu.dot_dimension_numbers<[1], [0], [0], [1], [0, 0, 1, 1], [], []>} : vector<5x64xf32>, vector<64x128xf32>, vector<5x128xf32> -> vector<5x128xf32>
    %c0_13 = arith.constant 0 : index
    %c0_14 = arith.constant 0 : index
    %15 = vector.load %arg8[%c0_13, %c0_14] : memref<5x1xf32, #tpu.memory_space<vmem>>, vector<5x1xf32>
    %16 = vector.broadcast %15 : vector<5x1xf32> to vector<5x128xf32>
    %17 = arith.addf %14, %16 : vector<5x128xf32>
    %18 = vector.extract_strided_slice %17 {offsets = [0, 0], sizes = [4, 128], strides = [1, 1]} : vector<5x128xf32> to vector<4x128xf32>
    %19 = math.tanh %18 : vector<4x128xf32>
    %20 = vector.extract_strided_slice %17 {offsets = [4, 0], sizes = [1, 128], strides = [1, 1]} : vector<5x128xf32> to vector<1x128xf32>
    %c0_15 = arith.constant 0 : index
    %c0_16 = arith.constant 0 : index
    %21 = vector.load %arg2[%c0_15, %c0_16] : memref<4x128xf32, #tpu.memory_space<vmem>>, vector<4x128xf32>
    %22 = arith.subf %21, %19 : vector<4x128xf32>
    %23 = arith.mulf %22, %22 : vector<4x128xf32>
    %c0_17 = arith.constant 0 : index
    %c0_18 = arith.constant 0 : index
    %24 = vector.load %arg9[%c0_17, %c0_18] : memref<5x1xf32, #tpu.memory_space<vmem>>, vector<4x1xf32>
    %25 = vector.broadcast %24 : vector<4x1xf32> to vector<4x128xf32>
    %26 = arith.mulf %23, %25 : vector<4x128xf32>
    %cst_19 = arith.constant dense<0.000000e+00> : vector<128xf32>
    %27 = vector.multi_reduction <add>, %26, %cst_19 [0] : vector<4x128xf32> to vector<128xf32>
    %28 = vector.shape_cast %27 : vector<128xf32> to vector<1x128xf32>
    %cst_20 = arith.constant -5.000000e-01 : f32
    %29 = vector.broadcast %cst_20 : f32 to vector<1x128xf32>
    %30 = arith.mulf %29, %28 : vector<1x128xf32>
    %c4 = arith.constant 4 : index
    %c0_21 = arith.constant 0 : index
    %31 = vector.load %arg9[%c4, %c0_21] : memref<5x1xf32, #tpu.memory_space<vmem>>, vector<1x1xf32>
    %32 = vector.broadcast %31 : vector<1x1xf32> to vector<1x128xf32>
    %33 = arith.addf %30, %32 : vector<1x128xf32>
    %c0_22 = arith.constant 0 : index
    %c0_23 = arith.constant 0 : index
    %34 = vector.load %arg10[%c0_22, %c0_23] : memref<6x128xf32, #tpu.memory_space<vmem>>, vector<4x128xf32>
    tpu.vector_store %arg10[%c0_22, %c0_23], %19 {strides = array<i32>} : memref<6x128xf32, #tpu.memory_space<vmem>>, vector<4x128xf32>,
    %c4_24 = arith.constant 4 : index
    %c0_25 = arith.constant 0 : index
    %35 = vector.load %arg10[%c4_24, %c0_25] : memref<6x128xf32, #tpu.memory_space<vmem>>, vector<1x128xf32>
    tpu.vector_store %arg10[%c4_24, %c0_25], %33 {strides = array<i32>} : memref<6x128xf32, #tpu.memory_space<vmem>>, vector<1x128xf32>,
    %c5 = arith.constant 5 : index
    %c0_26 = arith.constant 0 : index
    %36 = vector.load %arg10[%c5, %c0_26] : memref<6x128xf32, #tpu.memory_space<vmem>>, vector<1x128xf32>
    tpu.vector_store %arg10[%c5, %c0_26], %20 {strides = array<i32>} : memref<6x128xf32, #tpu.memory_space<vmem>>, vector<1x128xf32>,
    return
  }
  func.func @transform_0(%arg0: i32) -> (i32, i32) {
    %c0_i32 = arith.constant 0 : i32
    %c0_i32_0 = arith.constant 0 : i32
    return %c0_i32, %arg0 : i32, i32
  }
  func.func @transform_1(%arg0: i32) -> (i32, i32) {
    %c0_i32 = arith.constant 0 : i32
    %c0_i32_0 = arith.constant 0 : i32
    return %c0_i32, %arg0 : i32, i32
  }
  func.func @transform_2(%arg0: i32) -> (i32, i32) {
    %c0_i32 = arith.constant 0 : i32
    %c0_i32_0 = arith.constant 0 : i32
    %c0_i32_1 = arith.constant 0 : i32
    return %c0_i32, %c0_i32_0 : i32, i32
  }
  func.func @transform_3(%arg0: i32) -> (i32, i32) {
    %c0_i32 = arith.constant 0 : i32
    %c0_i32_0 = arith.constant 0 : i32
    %c0_i32_1 = arith.constant 0 : i32
    return %c0_i32, %c0_i32_0 : i32, i32
  }
  func.func @transform_4(%arg0: i32) -> (i32, i32) {
    %c0_i32 = arith.constant 0 : i32
    %c0_i32_0 = arith.constant 0 : i32
    %c0_i32_1 = arith.constant 0 : i32
    return %c0_i32, %c0_i32_0 : i32, i32
  }
  func.func @transform_5(%arg0: i32) -> (i32, i32) {
    %c0_i32 = arith.constant 0 : i32
    %c0_i32_0 = arith.constant 0 : i32
    %c0_i32_1 = arith.constant 0 : i32
    return %c0_i32, %c0_i32_0 : i32, i32
  }
  func.func @transform_6(%arg0: i32) -> (i32, i32) {
    %c0_i32 = arith.constant 0 : i32
    %c0_i32_0 = arith.constant 0 : i32
    %c0_i32_1 = arith.constant 0 : i32
    return %c0_i32, %c0_i32_0 : i32, i32
  }
  func.func @transform_7(%arg0: i32) -> (i32, i32) {
    %c0_i32 = arith.constant 0 : i32
    %c0_i32_0 = arith.constant 0 : i32
    %c0_i32_1 = arith.constant 0 : i32
    return %c0_i32, %c0_i32_0 : i32, i32
  }
  func.func @transform_8(%arg0: i32) -> (i32, i32) {
    %c0_i32 = arith.constant 0 : i32
    %c0_i32_0 = arith.constant 0 : i32
    %c0_i32_1 = arith.constant 0 : i32
    return %c0_i32, %c0_i32_0 : i32, i32
  }
  func.func @transform_9(%arg0: i32) -> (i32, i32) {
    %c0_i32 = arith.constant 0 : i32
    %c0_i32_0 = arith.constant 0 : i32
    return %c0_i32, %arg0 : i32, i32
  }
}

</mosaic_0001>

<bundles_post_ra>
// kernel: tpu_custom_call.1
= control target key start
LH: loop header
LB: loop body
LE: loop exit
PB: predicated region body
PF: predicated region fallthrough
CT: control target
= control target key end

     0   :  { %14 = vsyncpa [#allocation3], 0  ;;  %s1689_s0 = inlined_call_operand.vmem [shape: f32[8,200], index: 0, kind: input, shape index: {}]   ;;  %s1690_s1 = inlined_call_operand.vmem [shape: f32[4,200], index: 1, kind: input, shape index: {}]   ;;  %s1691_s2 = inlined_call_operand.vmem [shape: f32[128,8], index: 2, kind: input, shape index: {}]   ;;  %s1692_s3 = inlined_call_operand.vmem [shape: f32[128,1], index: 3, kind: input, shape index: {}]   ;;  %s1693_s4 = inlined_call_operand.vmem [shape: f32[64,128], index: 4, kind: input, shape index: {}]   ;;  %s1694_s5 = inlined_call_operand.vmem [shape: f32[64,1], index: 5, kind: input, shape index: {}]   ;;  %s1695_s6 = inlined_call_operand.vmem [shape: f32[5,64], index: 6, kind: input, shape index: {}]   ;;  %s1696_s7 = inlined_call_operand.vmem [shape: f32[5,1], index: 7, kind: input, shape index: {}]   ;;  %s1697_s8 = inlined_call_operand.vmem [shape: f32[5,1], index: 8, kind: input, shape index: {}]   ;;  %s1698_s9 = inlined_call_operand.hbm [shape: f32[6,200], index: 9, kind: output, shape index: {}]  }
   0x1   :  { %16 = vsyncpa [#allocation3 + $0x1], 0  ;;  %s1410_s30 = smov 0   ;;  %s1412_s10 = smov 0  }
   0x2   :  { %s1414_s11 = smov 0   ;;  %s1416_s12 = smov 0  }
   0x3 LB: > { %s1431_s13 = sadd.s32 4294967295, %s1354_s12   ;;  %s1033_s14 = sadd.s32 4294967294, %s1354_s12   ;;  %s1354_s12 = sphi %s1416_s12, %s1706_s12   ;;  %s1350_s11 = sphi %s1414_s11, %s1705_s11   ;;  %s1346_s10 = sphi %s1412_s10, %s1704_s10   ;;  %s1342_s30 = sphi %s1410_s30, %s1703_s30  }
   0x4   : > { %s1435_s15 = sadd.s32 1, %s1354_s12   ;;  %s228_s16 = sadd.s32 1, %s1350_s11 }
   0x5   : > { %s225_s17 = ssub.s32 %s1354_s12, %s1435_s15  ;;  %p238_p0 = scmp.ne.s32.totalorder %s1350_s11, %s1346_s10 }
   0x6   : > { %p226_p1 = scmp.eq.s32.totalorder %s225_s17, 0  ;;  %p239_p2 = scmp.eq.s32.totalorder %s1431_s13, 1 }
   0x7   : > { %p244_p3 = scmp.ne.s32.totalorder %s1346_s10, %s1342_s30  ;;  %p245_p4 = scmp.eq.s32.totalorder %s1033_s14, 1 }
   0x8   : > { %s1446_s18 = scalar_select %p226_p1, %s1350_s11, %s228_s16  }
   0x9   : > { %p1448_p5 = por %p239_p2, %p238_p0  ;;  %p1452_p6 = por %p245_p4, %p244_p3 }
   0xa   : > { %1699 = sst [smem:[#allocation5_spill]] %s1446_s18  ;;  %p1036_p7 = scmp.ge.s32.totalorder %s1354_s12, 1 }
   0xb   : > { %p298_p8 = scmp.lt.s32.totalorder %s1354_s12, 3 }
   0xd   : > { %p299_p9 = pnand %p1036_p7, %p298_p8 }
   0xe   : > { %p337_p10 = scmp.lt.s32.totalorder (!%p299_p9), %s1431_s13, 1  ;;  %s334_s21 = sand.u32 (!%p299_p9), 1, %s1346_s10  }
   0xf   : > { %302 = sbr.rel (%p299_p9) target bundleno = 777 (0x309), region = 56  ;;  %s1037_s22 = sshll.u32 (!%p299_p9), %s334_s21, 3 }
  0x10   : > { %s949_s17 = scalar_lea.sflag (!%p299_p9), [#allocation3], %s334_s21 }
  0x14   : > { %v346_v0 = vld [vmem:[%s1691_s2] sm:$0xff]  ;;  %vm458_vm0 = vcmask 64512   ;;  %v1356_v1 = vmov 0   ;;  %s1464_s23 = scalar_select %p337_p10, %s1431_s13, 1  ;;  %v377_v2 = vld [vmem:[%s1692_s3 + $0x78] sm:$0xff]  ;;  %v375_v3 = vld [vmem:[%s1692_s3 + $0x68] sm:$0xff] }
  0x15   : > { %1113 = vmatprep.mubr.msk.f32.mxu0 %vm458_vm0, %v346_v0  ;;  %1242 = vset.pattern.permute.xlu0 %v1356_v1  ;;  %v347_v5 = vld [vmem:[%s1691_s2 + $0x8] sm:$0xff]  ;;  %v348_v6 = vld [vmem:[%s1691_s2 + $0x10] sm:$0xff]  ;;  %v374_v8 = vld [vmem:[%s1692_s3 + $0x60] sm:$0xff]  ;;  %vm1358_vm1 = vmmov 0   ;;  %vm844_vm2 = vcmask 523264   ;;  %vm929_vm3 = vcmask 1043456  }
  0x16   : > { %1243 = vset.pattern.permute.xlu1 %v1356_v1  ;;  %s1038_s24 = sshll.u32 %s1464_s23, 3  ;;  %455 = vperm.xlu0 %1242, %v377_v2   ;;  %v376_v7 = vld [vmem:[%s1692_s3 + $0x70] sm:$0xff]  ;;  %v349_v9 = vld [vmem:[%s1691_s2 + $0x18] sm:$0xff]  ;;  %v350_v10 = vld [vmem:[%s1691_s2 + $0x20] sm:$0xff]  ;;  %s1039_s25 = sshll.u32 %s1464_s23, 2 }
  0x17   : > { %s340_s27 = scalar_lea.vmem %s1689_s0, %s1038_s24  ;;  %445 = vperm.xlu1 %1243, %v375_v3   ;;  %v373_v11 = vld [vmem:[%s1692_s3 + $0x58] sm:$0xff]  ;;  %v372_v12 = vld [vmem:[%s1692_s3 + $0x50] sm:$0xff]  ;;  %v351_v13 = vld [vmem:[%s1691_s2 + $0x28] sm:$0xff]  ;;  %s336_s24 = scalar_lea.vmem [#allocation2], %s1037_s22 }
  0x18   : > { %v345_v4 = vld [vmem:[%s340_s27] sm:$0xff]  ;;  %v352_v14 = vld [vmem:[%s1691_s2 + $0x30] sm:$0xff]  ;;  %v371_v15 = vld [vmem:[%s1692_s3 + $0x48] sm:$0xff]  ;;  %s344_s27 = scalar_lea.vmem %s1690_s1, %s1039_s25  ;;  %s1058_s23 = sshll.u32 %s1431_s13, 7 }
  0x19   : > { %1111 = vmatprep.subr.mxu0 %v345_v4  ;;  %v370_v16 = vld [vmem:[%s1692_s3 + $0x40] sm:$0xff]  ;;  %v353_v17 = vld [vmem:[%s1691_s2 + $0x38] sm:$0xff]  ;;  %v368_v20 = vld [vmem:[%s1692_s3 + $0x30] sm:$0xff]  ;;  %s962_s29 = sshll.u32 %s336_s24, 4  ;;  %s960_s16 = scalar_lea.hbm %s1698_s9, %s1058_s23  ;;  %s963_s29 = int_to_ptr.vmem [resolvable:$true] %s962_s29 }
  0x1a   : > { %1112 = vmatpush3.msra.mxu0 %v345_v4  ;;  %450 = vperm.xlu0 %1242, %v376_v7   ;;  %v354_v18 = vld [vmem:[%s1691_s2 + $0x40] sm:$0xff]  ;;  %v369_v19 = vld [vmem:[%s1692_s3 + $0x38] sm:$0xff]  ;;  %v355_v21 = vld [vmem:[%s1691_s2 + $0x48] sm:$0xff]  ;;  %s1294_s22 = scalar_lea.vmem %s963_s29, 128  ;;  %s1359_s25 = smov [#allocation2]  }
  0x1b   : > { %1114 = vmatmul.mubr.msk.f32.vlgmr.msra.gmra.mxu0 %vm458_vm0, %v347_v5  ;;  %440 = vperm.xlu1 %1243, %v374_v8   ;;  %v356_v22 = vld [vmem:[%s1691_s2 + $0x50] sm:$0xff]  ;;  %v367_v23 = vld [vmem:[%s1692_s3 + $0x28] sm:$0xff]  ;;  %v366_v24 = vld [vmem:[%s1692_s3 + $0x20] sm:$0xff]  ;;  %p1295_p11 = scmp.ne.s32.totalorder %s963_s29, %s1294_s22  ;;  %s1298_s26 = sshll.u32 %s1359_s25, 4  ;;  %s1299_s26 = int_to_ptr.vmem [resolvable:$false] %s1298_s26 }
  0x1c   : > { %1116 = vmatprep.mubr.msk.f32.mxu0 %vm458_vm0, %v348_v6  ;;  %v357_v25 = vld [vmem:[%s1691_s2 + $0x58] sm:$0xff]  ;;  %v358_v26 = vld [vmem:[%s1691_s2 + $0x60] sm:$0xff]  ;;  %v364_v28 = vld [vmem:[%s1692_s3 + $0x10] sm:$0xff]  ;;  %s1300_s13 = scalar_lea.vmem %s1299_s26, 256  ;;  %p1301_p0 = scmp.lt.s32.totalorder %s963_s29, %s1299_s26 }
  0x1d   : > { %v365_v27 = vld [vmem:[%s1692_s3 + $0x18] sm:$0xff]  ;;  %v359_v29 = vld [vmem:[%s1691_s2 + $0x68] sm:$0xff]  ;;  %v360_v30 = vld [vmem:[%s1691_s2 + $0x70] sm:$0xff]  ;;  %p1296_p12 = pnand %p1295_p11, %p1448_p5  ;;  %p1302_p1 = scmp.lt.s32.totalorder %s1300_s13, %s1294_s22 }
  0x1e   : > { %435 = vperm.xlu0 %1242, %v373_v11   ;;  %v363_v31 = vld [vmem:[%s1692_s3 + $0x8] sm:$0xff]  ;;  %v362_v32 = vld [vmem:[%s1692_s3] sm:$0xff]  ;;  %v361_v33 = vld [vmem:[%s1691_s2 + $0x78] sm:$0xff] }
  0x1f   : > { %1117 = vmatmul.mubr.msk.f32.gmra.mxu0 %vm458_vm0, %v349_v9  ;;  %430 = vperm.xlu1 %1243, %v372_v12   ;;  %v683_v34 = vld [vmem:[%s1694_s5 + $0x38] sm:$0xff]  ;;  %v682_v35 = vld [vmem:[%s1694_s5 + $0x30] sm:$0xff]  ;;  %v681_v36 = vld [vmem:[%s1694_s5 + $0x28] sm:$0xff]  ;;  %p1297_p13 = pneg %p1296_p12  ;;  %p1303_p2 = por %p1302_p1, %p1301_p0 }
  0x20   : > { %1119 = vmatprep.mubr.msk.f32.mxu0 %vm458_vm0, %v350_v10  ;;  %v680_v37 = vld [vmem:[%s1694_s5 + $0x20] sm:$0xff]  ;;  %v679_v38 = vld [vmem:[%s1694_s5 + $0x18] sm:$0xff]  ;;  %v678_v39 = vld [vmem:[%s1694_s5 + $0x10] sm:$0xff] }
  0x21   : > { %v677_v40 = vld [vmem:[%s1694_s5 + $0x8] sm:$0xff]  ;;  %v676_v41 = vld [vmem:[%s1694_s5] sm:$0xff]  ;;  %p1304_p3 = pnand %p1303_p2, %p1297_p13 }
  0x22   : > { %425 = vperm.xlu0 %1242, %v371_v15   ;;  %v838_v42 = vld [vmem:[%s1696_s7] sm:$0x1f] }
  0x23   : > { %1120 = vmatmul.mubr.msk.f32.gmra.mxu0 %vm458_vm0, %v351_v13  ;;  %420 = vperm.xlu1 %1243, %v370_v16   ;;  %v922_v43 = vld [vmem:[%s1697_s8] sm:$0xf]  ;;  %v938_v44 = vld [vmem:[%s1697_s8 + $0x4] sm:$0x1] }
  0x24   : > { %1122 = vmatprep.mubr.msk.f32.mxu0 %vm458_vm0, %v352_v14  ;;  %v668_v45 = vld [vmem:[%s1693_s4] sm:$0xff] }
  0x25   : > { %1169 = vmatprep.mubr.f32.mxu1 %v668_v45 }
  0x26   : > { %415 = vperm.xlu0 %1242, %v369_v19  }
  0x27   : > { %1123 = vmatmul.mubr.msk.f32.gmra.mxu0 %vm458_vm0, %v353_v17  ;;  %410 = vperm.xlu1 %1243, %v368_v20  }
  0x28   : > { %1125 = vmatprep.mubr.msk.f32.mxu0 %vm458_vm0, %v354_v18 }
  0x2a   : > { %405 = vperm.xlu0 %1242, %v367_v23  }
  0x2b   : > { %1126 = vmatmul.mubr.msk.f32.gmra.mxu0 %vm458_vm0, %v355_v21  ;;  %400 = vperm.xlu1 %1243, %v366_v24  }
  0x2c   : > { %1128 = vmatprep.mubr.msk.f32.mxu0 %vm458_vm0, %v356_v22 }
  0x2e   : > { %395 = vperm.xlu0 %1242, %v365_v27  }
  0x2f   : > { %1129 = vmatmul.mubr.msk.f32.gmra.mxu0 %vm458_vm0, %v357_v25  ;;  %390 = vperm.xlu1 %1243, %v364_v28  }
  0x30   : > { %1131 = vmatprep.mubr.msk.f32.mxu0 %vm458_vm0, %v358_v26 }
  0x32   : > { %385 = vperm.xlu0 %1242, %v363_v31  }
  0x33   : > { %1132 = vmatmul.mubr.msk.f32.gmra.mxu0 %vm458_vm0, %v359_v29  ;;  %380 = vperm.xlu1 %1243, %v362_v32  }
  0x34   : > { %1134 = vmatprep.mubr.msk.f32.mxu0 %vm458_vm0, %v360_v30 }
  0x36   : > { %721 = vperm.xlu0 %1242, %v683_v34  }
  0x37   : > { %1135 = vmatmul.mubr.msk.f32.gmra.mxu0 %vm458_vm0, %v361_v33  ;;  %716 = vperm.xlu1 %1243, %v682_v35  }
  0x3a   : > { %711 = vperm.xlu0 %1242, %v681_v36  }
  0x3b   : > { %706 = vperm.xlu1 %1243, %v680_v37  }
  0x3e   : > { %701 = vperm.xlu0 %1242, %v679_v38  }
  0x3f   : > { %696 = vperm.xlu1 %1243, %v678_v39  }
  0x42   : > { %691 = vperm.xlu0 %1242, %v677_v40  }
  0x43   : > { %686 = vperm.xlu1 %1243, %v676_v41  }
  0x46   : > { %841 = vperm.xlu0 %1242, %v838_v42  }
  0x47   : > { %925 = vperm.xlu1 %1243, %v922_v43  }
  0x4a   : > { %941 = vperm.xlu0 %1242, %v938_v44  }
  0x91   : > { %v456_v51 = vpop.permute.xlu0 %455 }
  0x92   : > { %v446_v53 = vpop.permute.xlu1 %445 }
  0x95   : > { %v451_v56 = vpop.permute.xlu0 %450 }
  0x96   : > { %v441_v58 = vpop.permute.xlu1 %440 }
  0x99   : > { %v436_v61 = vpop.permute.xlu0 %435 }
  0x9a   : > { %v431_v63 = vpop.permute.xlu1 %430 }
  0x9d   : > { %v426_v2 = vpop.permute.xlu0 %425 }
  0x9e   : > { %v421_v5 = vpop.permute.xlu1 %420 }
  0xa1   : > { %v416_v10 = vpop.permute.xlu0 %415 }
  0xa2   : > { %v411_v12 = vpop.permute.xlu1 %410 }
  0xa5   : > { %v406_v15 = vpop.permute.xlu0 %405 }
  0xa6   : > { %v401_v17 = vpop.permute.xlu1 %400 }
  0xa9   : > { %v396_v22 = vpop.permute.xlu0 %395 }
  0xaa   : > { %v391_v25 = vpop.permute.xlu1 %390 }
  0xad   : > { %v386_v30 = vpop.permute.xlu0 %385 }
  0xae   : > { %v381_v33 = vpop.permute.xlu1 %380 }
  0xdb   : > { %v1614_v46 = vpop.f32.mrf.mxu0 }
  0xdc   : > { %v579_v34 = vadd.f32 %v1614_v46, %v386_v30  ;;  %v669_v46 = vld [vmem:[%s1693_s4 + $0x8] sm:$0xff] }
  0xdd   : > { %v1616_v47 = vpop.f32.mrf.mxu0 }
  0xde   : > { %v574_v36 = vadd.f32 %v1616_v47, %v381_v33  ;;  %v670_v47 = vld [vmem:[%s1693_s4 + $0x10] sm:$0xff] }
  0xdf   : > { %v1118_v48 = vpop.f32.mrf.mxu0 }
  0xe0   : > { %v589_v28 = vadd.f32 %v1118_v48, %v396_v22  ;;  %v671_v48 = vld [vmem:[%s1693_s4 + $0x18] sm:$0xff] }
  0xe1   : > { %v1618_v49 = vpop.f32.mrf.mxu0 }
  0xe2   : > { %v584_v31 = vadd.f32 %v1618_v49, %v391_v25  ;;  %v672_v49 = vld [vmem:[%s1693_s4 + $0x20] sm:$0xff] }
  0xe3   : > { %v1121_v50 = vpop.f32.mrf.mxu0 }
  0xe4   : > { %v599_v23 = vadd.f32 %v1121_v50, %v406_v15  ;;  %v673_v50 = vld [vmem:[%s1693_s4 + $0x28] sm:$0xff] }
  0xe5   : > { %v593_v52 = vpop.f32.mrf.mxu0 }
  0xe6   : > { %v594_v26 = vadd.f32 %v593_v52, %v401_v17  ;;  %v675_v52 = vld [vmem:[%s1693_s4 + $0x38] sm:$0xff] }
  0xe7   : > { %v1124_v54 = vpop.f32.mrf.mxu0 }
  0xe8   : > { %v609_v18 = vadd.f32 %v1124_v54, %v416_v10 }
  0xe9   : > { %v603_v55 = vpop.f32.mrf.mxu0 }
  0xea   : > { %v604_v20 = vadd.f32 %v603_v55, %v411_v12 }
  0xeb   : > { %v1127_v57 = vpop.f32.mrf.mxu0 }
  0xec   : > { %v619_v14 = vadd.f32 %v1127_v57, %v426_v2 }
  0xed   : > { %v613_v59 = vpop.f32.mrf.mxu0 }
  0xee   : > { %v614_v16 = vadd.f32 %v613_v59, %v421_v5 }
  0xef   : > { %v1130_v60 = vpop.f32.mrf.mxu0 }
  0xf0   : > { %v629_v11 = vadd.f32 %v1130_v60, %v436_v61 }
  0xf1   : > { %v623_v62 = vpop.f32.mrf.mxu0 }
  0xf2   : > { %v624_v13 = vadd.f32 %v623_v62, %v431_v63 }
  0xf3   : > { %v1133_v0 = vpop.f32.mrf.mxu0 }
  0xf4   : > { %v639_v7 = vadd.f32 %v1133_v0, %v446_v53  ;;  %v1357_v53 = vmov 0.0  }
  0xf5   : > { %v633_v1 = vpop.f32.mrf.mxu0  ;;  %1181 = vmatprep.subr.mxu0 %v1357_v53  ;;  %1197 = vmatprep.mubr.msk.f32.mxu0 %vm1358_vm1, %v1357_v53 }
  0xf6   : > { %v634_v9 = vadd.f32 %v633_v1, %v441_v58  ;;  %v717_v58 = vpop.permute.xlu1 %716 }
  0xf7   : > { %v1136_v3 = vpop.f32.mrf.mxu0 }
  0xf8   : > { %v649_v4 = vadd.f32 %v1136_v3, %v456_v51  ;;  %v674_v51 = vld [vmem:[%s1693_s4 + $0x30] sm:$0xff] }
  0xf9   : > { %v643_v6 = vpop.f32.mrf.mxu0 }
  0xfa   : > { %1244 = vtanh.f32 %v649_v4  ;;  %v644_v8 = vadd.f32 %v643_v6, %v451_v56  ;;  %v722_v56 = vpop.permute.xlu0 %721  ;;  %v707_v63 = vpop.permute.xlu1 %706 }
  0xfc   : > { %1246 = vtanh.f32 %v644_v8 }
  0xfd   : > { %1248 = vtanh.f32 %v639_v7 }
  0xfe   : > { %1250 = vtanh.f32 %v634_v9  ;;  %v712_v61 = vpop.permute.xlu0 %711  ;;  %v697_v7 = vpop.permute.xlu1 %696 }
  0xff   : > { %1252 = vtanh.f32 %v629_v11 }
 0x100   : > { %1254 = vtanh.f32 %v624_v13 }
 0x101   : > { %1256 = vtanh.f32 %v619_v14 }
 0x102   : > { %1258 = vtanh.f32 %v614_v16  ;;  %v702_v5 = vpop.permute.xlu0 %701  ;;  %v687_v12 = vpop.permute.xlu1 %686 }
 0x103   : > { %1260 = vtanh.f32 %v609_v18 }
 0x104   : > { %1262 = vtanh.f32 %v604_v20 }
 0x105   : > { %1264 = vtanh.f32 %v599_v23 }
 0x106   : > { %1266 = vtanh.f32 %v594_v26  ;;  %v692_v10 = vpop.permute.xlu0 %691 }
 0x107   : > { %v1245_v19 = vpop.eup %1244  ;;  %1268 = vtanh.f32 %v589_v28 }
 0x108   : > { %1137 = vmatprep.subr.mxu1 %v1245_v19  ;;  %1270 = vtanh.f32 %v584_v31  ;;  %v926_v31 = vpop.permute.xlu1 %925 }
 0x109   : > { %v1247_v21 = vpop.eup %1246  ;;  %1138 = vmatpush3.msra.mxu1 %v1245_v19  ;;  %1272 = vtanh.f32 %v579_v34 }
 0x10a   : > { %1139 = vmatprep.subr.mxu1 %v1247_v21  ;;  %v1249_v24 = vpop.eup %1248  ;;  %1274 = vtanh.f32 %v574_v36  ;;  %v842_v23 = vpop.permute.xlu0 %841 }
 0x10b   : > { %1140 = vmatpush3.msra.mxu1 %v1247_v21  ;;  %v1251_v27 = vpop.eup %1250  ;;  %v837_v21 = vld [vmem:[%s1695_s6] sm:$0x1f] }
 0x10c   : > { %1141 = vmatprep.subr.mxu1 %v1249_v24  ;;  %v1253_v29 = vpop.eup %1252 }
 0x10d   : > { %1142 = vmatpush3.msra.mxu1 %v1249_v24  ;;  %v1255_v32 = vpop.eup %1254 }
 0x10e   : > { %1143 = vmatprep.subr.mxu1 %v1251_v27  ;;  %v1257_v35 = vpop.eup %1256 }
 0x10f   : > { %1144 = vmatpush3.msra.mxu1 %v1251_v27  ;;  %v1259_v37 = vpop.eup %1258  ;;  %v919_v27 = vld [vmem:[%s344_s27] sm:$0xf] }
 0x110   : > { %1145 = vmatprep.subr.mxu1 %v1253_v29  ;;  %v1261_v38 = vpop.eup %1260 }
 0x111   : > { %1146 = vmatpush3.msra.mxu1 %v1253_v29  ;;  %v1263_v39 = vpop.eup %1262 }
 0x112   : > { %1147 = vmatprep.subr.mxu1 %v1255_v32  ;;  %v1265_v40 = vpop.eup %1264 }
 0x113   : > { %1148 = vmatpush3.msra.mxu1 %v1255_v32  ;;  %v1267_v41 = vpop.eup %1266 }
 0x114   : > { %1149 = vmatprep.subr.mxu1 %v1257_v35  ;;  %v1269_v42 = vpop.eup %1268 }
 0x115   : > { %1150 = vmatpush3.msra.mxu1 %v1257_v35  ;;  %v1271_v43 = vpop.eup %1270 }
 0x116   : > { %1151 = vmatprep.subr.mxu1 %v1259_v37  ;;  %v1273_v44 = vpop.eup %1272 }
 0x117   : > { %1152 = vmatpush3.msra.mxu1 %v1259_v37  ;;  %v1275_v45 = vpop.eup %1274 }
 0x118   : > { %1153 = vmatprep.subr.mxu1 %v1261_v38 }
 0x119   : > { %1154 = vmatpush3.msra.mxu1 %v1261_v38 }
 0x11a   : > { %1155 = vmatprep.subr.mxu1 %v1263_v39 }
 0x11b   : > { %1156 = vmatpush3.msra.mxu1 %v1263_v39 }
 0x11c   : > { %1157 = vmatprep.subr.mxu1 %v1265_v40 }
 0x11d   : > { %1158 = vmatpush3.msra.mxu1 %v1265_v40 }
 0x11e   : > { %1159 = vmatprep.subr.mxu1 %v1267_v41 }
 0x11f   : > { %1160 = vmatpush3.msra.mxu1 %v1267_v41  ;;  %v942_v41 = vpop.permute.xlu0 %941 }
 0x120   : > { %1161 = vmatprep.subr.mxu1 %v1269_v42 }
 0x121   : > { %1162 = vmatpush3.msra.mxu1 %v1269_v42 }
 0x122   : > { %1163 = vmatprep.subr.mxu1 %v1271_v43 }
 0x123   : > { %1164 = vmatpush3.msra.mxu1 %v1271_v43 }
 0x124   : > { %1165 = vmatprep.subr.mxu1 %v1273_v44 }
 0x125   : > { %1166 = vmatpush3.msra.mxu1 %v1273_v44 }
 0x126   : > { %1167 = vmatprep.subr.mxu1 %v1275_v45 }
 0x127   : > { %1168 = vmatpush3.msra.mxu1 %v1275_v45 }
 0x128   : > { %1170 = vmatmul.mubr.f32.vlgmr.msra.gmra.mxu1 %v669_v46 }
 0x129   : > { %1172 = vmatprep.mubr.f32.mxu1 %v670_v47 }
 0x12c   : > { %1173 = vmatmul.mubr.f32.gmra.mxu1 %v671_v48 }
 0x12d   : > { %1175 = vmatprep.mubr.f32.mxu1 %v672_v49 }
 0x130   : > { %1176 = vmatmul.mubr.f32.gmra.mxu1 %v673_v50 }
 0x131   : > { %1178 = vmatprep.mubr.f32.mxu1 %v674_v51 }
 0x134   : > { %1179 = vmatmul.mubr.f32.gmra.mxu1 %v675_v52 }
 0x1e8   : > { %v1171_v54 = vpop.f32.mrf.mxu1 }
 0x1e9   : > { %v796_v11 = vadd.f32 %v1171_v54, %v692_v10 }
 0x1ea   : > { %v790_v55 = vpop.f32.mrf.mxu1 }
 0x1eb   : > { %v791_v13 = vadd.f32 %v790_v55, %v687_v12 }
 0x1ec   : > { %v1174_v57 = vpop.f32.mrf.mxu1 }
 0x1ed   : > { %v806_v8 = vadd.f32 %v1174_v57, %v702_v5 }
 0x1ee   : > { %v800_v59 = vpop.f32.mrf.mxu1 }
 0x1ef   : > { %v801_v9 = vadd.f32 %v800_v59, %v697_v7 }
 0x1f0   : > { %v1177_v60 = vpop.f32.mrf.mxu1 }
 0x1f1   : > { %v816_v3 = vadd.f32 %v1177_v60, %v712_v61 }
 0x1f2   : > { %v810_v62 = vpop.f32.mrf.mxu1 }
 0x1f3   : > { %v811_v6 = vadd.f32 %v810_v62, %v707_v63 }
 0x1f4   : > { %v1180_v0 = vpop.f32.mrf.mxu1 }
 0x1f5   : > { %v826_v1 = vadd.f32 %v1180_v0, %v722_v56 }
 0x1f6   : > { %v820_v2 = vpop.f32.mrf.mxu1 }
 0x1f7   : > { %1276 = vtanh.f32 %v826_v1  ;;  %v821_v4 = vadd.f32 %v820_v2, %v717_v58 }
 0x1f9   : > { %1278 = vtanh.f32 %v821_v4 }
 0x1fa   : > { %1280 = vtanh.f32 %v816_v3 }
 0x1fb   : > { %1282 = vtanh.f32 %v811_v6 }
 0x1fc   : > { %1284 = vtanh.f32 %v806_v8 }
 0x1fd   : > { %1286 = vtanh.f32 %v801_v9 }
 0x1fe   : > { %1288 = vtanh.f32 %v796_v11 }
 0x1ff   : > { %1290 = vtanh.f32 %v791_v13 }
 0x204   : > { %v1277_v14 = vpop.eup %1276 }
 0x205   : > { %1182 = vmatpush3.msra.mxu0 %v1277_v14 }
 0x206   : > { %v1279_v15 = vpop.eup %1278  ;;  %1183 = vmatprep.subr.mxu0 %v1357_v53 }
 0x207   : > { %1184 = vmatpush3.msra.mxu0 %v1279_v15  ;;  %v1281_v16 = vpop.eup %1280 }
 0x208   : > { %1185 = vmatprep.subr.mxu0 %v1357_v53  ;;  %v1283_v17 = vpop.eup %1282 }
 0x209   : > { %1186 = vmatpush3.msra.mxu0 %v1281_v16  ;;  %v1285_v18 = vpop.eup %1284 }
 0x20a   : > { %1187 = vmatprep.subr.mxu0 %v1357_v53  ;;  %v1287_v19 = vpop.eup %1286 }
 0x20b   : > { %1188 = vmatpush3.msra.mxu0 %v1283_v17  ;;  %v1289_v20 = vpop.eup %1288 }
 0x20c   : > { %1189 = vmatprep.subr.mxu0 %v1357_v53  ;;  %v1291_v22 = vpop.eup %1290 }
 0x20d   : > { %1190 = vmatpush3.msra.mxu0 %v1285_v18 }
 0x20e   : > { %1191 = vmatprep.subr.mxu0 %v1357_v53 }
 0x20f   : > { %1192 = vmatpush3.msra.mxu0 %v1287_v19 }
 0x210   : > { %1193 = vmatprep.subr.mxu0 %v1357_v53 }
 0x211   : > { %1194 = vmatpush3.msra.mxu0 %v1289_v20 }
 0x212   : > { %1195 = vmatprep.subr.mxu0 %v1357_v53 }
 0x213   : > { %1196 = vmatpush3.msra.mxu0 %v1291_v22 }
 0x214   : > { %1198 = vmatmul.mubr.msk.f32.vlgmr.msra.gmra.mxu0 %vm844_vm2, %v837_v21 }
 0x2d4   : > { %v914_v24 = vpop.f32.mrf.mxu0 }
 0x2d5   : > { %v915_v25 = vadd.f32 %v914_v24, %v842_v23 }
 0x2d6   : > { %v1199_v26 = vpop.f32.mrf.mxu0 }
 0x2d7   : > { %1292 = vtanh.f32 %v915_v25  ;;  %947 = vst [vmem:[%s336_s24 + $0x1] sm:$0x10] %v915_v25 }
 0x2e4   : > { %v1293_v28 = vpop.eup %1292 }
 0x2e5   : > { %v920_v29 = vsub.f32 %v919_v27, %v1293_v28  ;;  %945 = vst [vmem:[%s336_s24] sm:$0xf] %v1293_v28 }
 0x2e7   : > { %v921_v30 = vmul.f32 %v920_v29, %v920_v29 }
 0x2e9   : > { %v928_v32 = vmul.f32 %v926_v31, %v921_v30 }
 0x2eb   : > { %v930_v33 = vsel %vm929_vm3, %v928_v32, 0.0 }
 0x2ec   : > { %v931_v34 = vrot.slane %v930_v33, 4 }
 0x2ee   : > { %v932_v35 = vadd.f32 %v931_v34, %v930_v33 }
 0x2f0   : > { %v933_v36 = vrot.slane %v932_v35, 2 }
 0x2f2   : > { %v934_v37 = vadd.f32 %v933_v36, %v932_v35 }
 0x2f4   : > { %v935_v38 = vrot.slane %v934_v37, 1 }
 0x2f6   : > { %v936_v39 = vadd.f32 %v935_v38, %v934_v37 }
 0x2f8   : > { %v937_v40 = vmul.f32 -0.5, %v936_v39 }
 0x2fa   : > { %v944_v42 = vadd.f32 %v942_v41, %v937_v40 }
 0x2fc   : > { %946 = vst [vmem:[%s336_s24 + $0x4] sm:$0x1] %v944_v42 }
 0x2fd   : > { %1307 = shalt.err (!%p1304_p3)
}
 0x2fe   : > { %s1308_s28 = scalar_lea.hbm %s960_s16, 128  ;;  %s1312_s27 = scalar_lea.hbm %s1698_s9, 256 }
 0x2ff   : > { %p1309_p4 = scmp.ne.s32.totalorder %s960_s16, %s1308_s28  ;;  %p1313_p9 = scmp.lt.s32.totalorder %s960_s16, %s1698_s9 }
 0x300   : > { %p1314_p10 = scmp.lt.s32.totalorder %s1312_s27, %s1308_s28 }
 0x301   : > { %p1310_p7 = pnand %p1309_p4, %p1448_p5 }
 0x302   : > { %p1315_p11 = por %p1314_p10, %p1313_p9 }
 0x303   : > { %p1311_p8 = pneg %p1310_p7 }
 0x305   : > { %p1316_p12 = pnand %p1315_p11, %p1311_p8 }
 0x307   : > { %1319 = shalt.err (!%p1316_p12)
}
 0x308   : > { %1200 = dma.vmem_to_hbm [thread:$0]  (%p1448_p5), %s963_s29, 128, %s960_s16, %s949_s17  }
 0x309 PF: > { %p1206_p13 = scmp.ge.s32.totalorder %s1354_s12, 2  ;;  %s974_s14 = sand.u32 1, %s1342_s30  }
 0x30a   : > { %s975_s22 = scalar_lea.sflag [#allocation3], %s974_s14 }
 0x30b   : > { %p1203_p0 = pnand %p1206_p13, %p1452_p6 }
 0x30d   : > { %p1204_p1 = pneg %p1203_p0 }
 0x30f   : > { %1337 = dma.done.wait (%p1204_p1), %s975_s22, 128  }
 0x310   : > { %1339 = vsyncadd (%p1204_p1), %s975_s22, 4294967168  ;;  %s1702_s25 = sld [smem:[#allocation5_spill]]  ;;  %p19_p2 = scmp.ge.s32.totalorder %s1435_s15, 4  }
 0x311   : > { %s1703_s30 = smov %s1346_s10  ;;  %s1704_s10 = smov %s1350_s11 }
 0x312   : > { %s1706_s12 = smov %s1435_s15  ;;  %21 = sbr.rel (!%p19_p2) target bundleno = 3 (0x3), region = 94 }
 0x316   : > { %s1705_s11 = smov %s1702_s25 }
 0x317   :  { %980 = vsyncpa [#allocation3], 1 }
 0x318   :  { %982 = vsyncpa [#allocation3 + $0x1], 1 }

</bundles_post_ra>
